<compile_context>
chip_gen: v7x
topology: tpu7x:2x2x1
jax: 0.10.0
libtpu: 0.0.40
codegen_flags: <defaults>
</compile_context>

<pallas_src>
import functools

import jax
import jax.numpy as jnp
from jax import lax
from jax.experimental import pallas as pl
from jax.experimental.pallas import tpu as pltpu


def mlp_kernel(x_ref, w1_ref, b1_ref, w2_ref, b2_ref, o_ref):
    # linear1: contract feature dim of x [TB, In] with feature dim of w1 [H, In]
    # -> [TB, H].  No wrapper-side transpose; the MXU takes the transposed
    # operand natively.
    h = lax.dot_general(
        x_ref[...], w1_ref[...],
        dimension_numbers=(((1,), (1,)), ((), ())),
        preferred_element_type=jnp.float32,
    )
    # bias + ReLU (VPU)
    h = jnp.maximum(h + b1_ref[...], 0.0)
    # linear2: single output column -> VPU multiply + lane reduce (XLU slot),
    # skipping a full MXU pass that would produce one column.
    logit = jnp.sum(h * w2_ref[...], axis=-1)[None, :] + b2_ref[...]   # [1, TB]
    # sigmoid (exp on the EUP), stored lane-dense as [1, TB].
    o_ref[...] = jax.nn.sigmoid(logit).astype(o_ref.dtype)


@functools.partial(jax.jit, static_argnames=("block_b",))
def neural_net1_forward(x, w1, b1, w2, b2, *, block_b=512):
    """x: [B, In]; w1: [H, In]; b1: [H]; w2: [1, H]; b2: [1].  Returns [B, 1]."""
    B, In = x.shape
    H = w1.shape[0]

    b1_2d = b1.reshape(1, H)     # [1, H]
    w2_row = w2.reshape(1, H)    # [1, H] (nn.Linear already stores it this way)
    b2_2d = b2.reshape(1, 1)     # [1, 1]

    out_shape = jax.ShapeDtypeStruct((1, B), jnp.float32)

    if B <= block_b or B % block_b != 0 or block_b % 8 != 0:
        # Small batch: single straight-line invocation, no grid machinery.
        out = pl.pallas_call(
            mlp_kernel,
            out_shape=out_shape,
        )(x, w1, b1_2d, w2_row, b2_2d)
    else:
        # Large batch: tile the batch dim; weights/biases stay resident.
        nb = B // block_b
        out = pl.pallas_call(
            mlp_kernel,
            out_shape=out_shape,
            grid=(nb,),
            in_specs=[
                pl.BlockSpec((block_b, In), lambda i: (i, 0)),
                pl.BlockSpec((H, In), lambda i: (0, 0)),
                pl.BlockSpec((1, H), lambda i: (0, 0)),
                pl.BlockSpec((1, H), lambda i: (0, 0)),
                pl.BlockSpec((1, 1), lambda i: (0, 0)),
            ],
            out_specs=pl.BlockSpec((1, block_b), lambda i: (0, i)),
            compiler_params=pltpu.CompilerParams(
                dimension_semantics=("parallel",)),
        )(x, w1, b1_2d, w2_row, b2_2d)

    # Match the PyTorch module's [B, 1] output.
    return out.reshape(B, 1)


def _reference(x, w1, b1, w2, b2):
    h = jnp.maximum(x @ w1.T + b1, 0.0)
    return jax.nn.sigmoid(h @ w2.T + b2)


if __name__ == "__main__":
    # Shapes consistent with the module's forward:
    #   input_size=16, hidden_size=32, batch=8
    batch, input_size, hidden_size = 8, 16, 32

    key = jax.random.PRNGKey(0)
    kx, kw1, kb1, kw2, kb2, kx2 = jax.random.split(key, 6)

    x = jax.random.normal(kx, (batch, input_size), dtype=jnp.float32)
    # nn.Linear layout: weight=[out, in], bias=[out].
    w1 = jax.random.normal(kw1, (hidden_size, input_size), dtype=jnp.float32) * 0.1
    b1 = jax.random.normal(kb1, (hidden_size,), dtype=jnp.float32) * 0.1
    w2 = jax.random.normal(kw2, (1, hidden_size), dtype=jnp.float32) * 0.1
    b2 = jax.random.normal(kb2, (1,), dtype=jnp.float32) * 0.1

    # Small-batch path (single invocation, no grid).
    y = jax.block_until_ready(neural_net1_forward(x, w1, b1, w2, b2))
    y_ref = _reference(x, w1, b1, w2, b2)
    assert y.shape == (batch, 1)
    assert jnp.allclose(y, y_ref, atol=1e-5, rtol=1e-5)

    # Larger-batch path (batch-tiled parallel grid, 2 tiles).
    big_b = 1024
    x_big = jax.random.normal(kx2, (big_b, input_size), dtype=jnp.float32)
    y_big = jax.block_until_ready(
        neural_net1_forward(x_big, w1, b1, w2, b2, block_b=512))
    y_big_ref = _reference(x_big, w1, b1, w2, b2)
    assert y_big.shape == (big_b, 1)
    assert jnp.allclose(y_big, y_big_ref, atol=1e-5, rtol=1e-5)

    print("KERNEL_OK")
</pallas_src>

<mosaic_0001>
module attributes {stable_mosaic.version = 11 : i64} {
  func.func @mlp_kernel(%arg0: memref<8x16xf32, #tpu.memory_space<vmem>>, %arg1: memref<32x16xf32, #tpu.memory_space<vmem>>, %arg2: memref<1x32xf32, #tpu.memory_space<vmem>>, %arg3: memref<1x32xf32, #tpu.memory_space<vmem>>, %arg4: memref<1x1xf32, #tpu.memory_space<vmem>>, %arg5: memref<1x8xf32, #tpu.memory_space<vmem>>) attributes {dimension_semantics = [], scalar_prefetch = 0 : i64, scratch_operands = 0 : i64, tpu.core_type = #tpu.core_type<tc>} {
    %c0 = arith.constant 0 : index
    %c0_0 = arith.constant 0 : index
    %0 = vector.load %arg0[%c0, %c0_0] : memref<8x16xf32, #tpu.memory_space<vmem>>, vector<8x16xf32>
    %c0_1 = arith.constant 0 : index
    %c0_2 = arith.constant 0 : index
    %1 = vector.load %arg1[%c0_1, %c0_2] : memref<32x16xf32, #tpu.memory_space<vmem>>, vector<32x16xf32>
    %cst = arith.constant dense<0.000000e+00> : vector<8x32xf32>
    %2 = tpu.matmul %0, %1, %cst {dimension_numbers = #tpu.dot_dimension_numbers<[1], [1], [0], [0], [0, 0, 1, 0], [], []>} : vector<8x16xf32>, vector<32x16xf32>, vector<8x32xf32> -> vector<8x32xf32>
    %c0_3 = arith.constant 0 : index
    %c0_4 = arith.constant 0 : index
    %3 = vector.load %arg2[%c0_3, %c0_4] : memref<1x32xf32, #tpu.memory_space<vmem>>, vector<1x32xf32>
    %4 = vector.broadcast %3 : vector<1x32xf32> to vector<8x32xf32>
    %5 = arith.addf %2, %4 : vector<8x32xf32>
    %cst_5 = arith.constant 0.000000e+00 : f32
    %6 = vector.broadcast %cst_5 : f32 to vector<8x32xf32>
    %7 = arith.maximumf %5, %6 : vector<8x32xf32>
    %c0_6 = arith.constant 0 : index
    %c0_7 = arith.constant 0 : index
    %8 = vector.load %arg3[%c0_6, %c0_7] : memref<1x32xf32, #tpu.memory_space<vmem>>, vector<1x32xf32>
    %9 = vector.broadcast %8 : vector<1x32xf32> to vector<8x32xf32>
    %10 = arith.mulf %7, %9 : vector<8x32xf32>
    %cst_8 = arith.constant dense<0.000000e+00> : vector<8xf32>
    %11 = vector.multi_reduction <add>, %10, %cst_8 [1] : vector<8x32xf32> to vector<8xf32>
    %12 = vector.shape_cast %11 : vector<8xf32> to vector<1x8xf32>
    %c0_9 = arith.constant 0 : index
    %c0_10 = arith.constant 0 : index
    %13 = vector.load %arg4[%c0_9, %c0_10] : memref<1x1xf32, #tpu.memory_space<vmem>>, vector<1x1xf32>
    %14 = vector.broadcast %13 : vector<1x1xf32> to vector<1x8xf32>
    %15 = arith.addf %12, %14 : vector<1x8xf32>
    %16 = arith.negf %15 : vector<1x8xf32>
    %17 = math.exp %16 : vector<1x8xf32>
    %cst_11 = arith.constant 1.000000e+00 : f32
    %18 = vector.broadcast %cst_11 : f32 to vector<1x8xf32>
    %19 = arith.addf %18, %17 : vector<1x8xf32>
    %20 = arith.divf %18, %19 : vector<1x8xf32>
    %c0_12 = arith.constant 0 : index
    %c0_13 = arith.constant 0 : index
    %21 = vector.load %arg5[%c0_12, %c0_13] : memref<1x8xf32, #tpu.memory_space<vmem>>, vector<1x8xf32>
    tpu.vector_store %arg5[%c0_12, %c0_13], %20 {strides = array<i32>} : memref<1x8xf32, #tpu.memory_space<vmem>>, vector<1x8xf32>,
    return
  }
}

</mosaic_0001>

<bundles_post_ra>
// kernel: neural_net1_forward.1
= control target key start
LH: loop header
LB: loop body
LE: loop exit
PB: predicated region body
PF: predicated region fallthrough
CT: control target
= control target key end

     0   :  { %s315_s0 = inlined_call_operand.vmem [shape: f32[8,16], index: 0, kind: input, shape index: {}]   ;;  %s316_s1 = inlined_call_operand.vmem [shape: f32[32,16], index: 1, kind: input, shape index: {}]   ;;  %s317_s2 = inlined_call_operand.vmem [shape: f32[1,32], index: 2, kind: input, shape index: {}]   ;;  %s318_s3 = inlined_call_operand.vmem [shape: f32[1,32], index: 3, kind: input, shape index: {}]   ;;  %s319_s4 = inlined_call_operand.<no memory space> [shape: f32[1,1], index: 4, kind: input, shape index: {}]   ;;  %s320_s5 = inlined_call_operand.hbm [shape: f32[1,8], index: 5, kind: output, shape index: {}]  }
   0x1   :  { %v10_v0 = vstv %s319_s4 }
   0x2   :  { %11 = vst [vmem:[#allocation2] sm:$0x1] %v10_v0 }
   0x3   :  { %v24_v1 = vld [vmem:[%s316_s1] sm:$0xff]  ;;  %v25_v2 = vld [vmem:[%s316_s1 + $0x8] sm:$0xff]  ;;  %vm35_vm0 = vcmask 130048   ;;  %v241_v3 = vmov 0.0|0.0   ;;  %vm242_vm2 = vmmov 0   ;;  %v243_v5 = vmov 0.0  }
   0x4   :  { %199 = vmatprep.subr.bf16.mxu0 %v241_v3  ;;  %v200_v4 = vpack.c.bf16 %v25_v2, %v24_v1  ;;  %vm201_vm1 = vmpackc.low %vm35_vm0, %vm35_vm0  ;;  %196 = vmatprep.mubr.msk.f32.mxu0 %vm242_vm2, %v243_v5 }
   0x5   :  { %12 = vsyncpa [#allocation4], 0  ;;  %v26_v6 = vld [vmem:[%s316_s1 + $0x10] sm:$0xff]  ;;  %v27_v7 = vld [vmem:[%s316_s1 + $0x18] sm:$0xff]  ;;  %v244_v10 = vmov 0   ;;  %vm130_vm3 = vcmask 261120   ;;  %v140_v20 = vlaneseq }
   0x6   :  { %202 = vmatpush3.bf16.xpose.msk.msra.mxu0 %vm201_vm1, %v200_v4  ;;  %v204_v8 = vpack.c.bf16 %v27_v7, %v26_v6  ;;  %v23_v9 = vld [vmem:[%s315_s0] sm:$0xff]  ;;  %212 = vset.pattern.permute.xlu0 %v244_v10  ;;  %s245_s0 = smov [#allocation3]   ;;  %vm159_vm4 = vcmask 57344  }
   0x7   :  { %203 = vmatprep.subr.bf16.mxu0 %v241_v3  ;;  %v175_v11 = vld [vmem:[%s317_s2] ss:$0 sm:$0xff]  ;;  %v141_v21 = vshrl.u32 %v140_v20, 7  ;;  %v153_v30 = vand.u32 127, %v140_v20  ;;  %s167_s1 = sshll.u32 %s245_s0, 4  ;;  %s168_s1 = int_to_ptr.vmem [resolvable:$true] %s167_s1 }
   0x8   :  { %v181_v15 = vld [vmem:[%s318_s3] ss:$0 sm:$0xff]  ;;  %s217_s2 = scalar_lea.vmem %s168_s1, 16  ;;  %s221_s3 = scalar_lea.vmem %s168_s1, 32 }
   0x9   :  { %v134_v19 = vld [vmem:[#allocation2] sm:$0x1]  ;;  %v142_v23 = vsub.s32 0, %v141_v21  ;;  %v156_v31 = vsub.s32 %v153_v30, %v141_v21  ;;  %p218_p0 = scmp.ne.s32.totalorder %s168_s1, %s217_s2  ;;  %p222_p1 = scmp.lt.s32.totalorder %s168_s1, %s168_s1 }
   0xa   :  { %p223_p2 = scmp.lt.s32.totalorder %s221_s3, %s217_s2 }
   0xc   :  { %p224_p3 = por %p223_p2, %p222_p1 }
   0xe   :  { %206 = vmatpush3.bf16.xpose.msk.msra.mxu0 %vm201_vm1, %v204_v8  ;;  %p225_p4 = pnand %p224_p3, %p218_p0 }
  0x15   :  { %197 = vmatmul.mubr.msk.f32.vlgmr.msra.gmra.mrb[0].mxu0 %vm35_vm0, %v23_v9 }
  0xe8   :  { %v117_v12 = vpop.f32.mrb[0].mxu0 }
  0xe9   :  { %v118_v13 = vadd.f32 %v175_v11, %v117_v12  ;;  %v198_v14 = vpop.f32.mrb[1].mxu0 }
  0xeb   :  { %v121_v16 = vmax.f32 %v118_v13, 0.0 }
  0xed   :  { %v129_v17 = vmul.f32 %v181_v15, %v121_v16 }
  0xef   :  { %v131_v18 = vsel %vm130_vm3, %v129_v17, 0.0 }
  0xf0   :  { %132 = vadd.xlane.f32.xlu0 %v131_v18 }
 0x106   :  { %137 = vperm.xlu0 %212, %v134_v19  }
 0x17d   :  { %v133_v22 = vpop.xlane.xlu0 %132 }
 0x185   :  { %v138_v24 = vpop.permute.xlu0 %137 }
 0x186   :  { %v143_v25 = vrot.slane %v138_v24, %v142_v23 }
 0x188   :  { %v144_v26 = vadd.f32 %v143_v25, %v133_v22 }
 0x18a   :  { %v182_v27 = vmul.f32 -1.442695, %v144_v26 }
 0x18c   :  { %213 = vpow2.f32 %v182_v27 }
 0x196   :  { %v214_v28 = vpop.eup %213 }
 0x197   :  { %v148_v29 = vadd.f32 1.0, %v214_v28 }
 0x199   :  { %215 = vrcp.f32 %v148_v29 }
 0x1a3   :  { %v216_v32 = vpop.eup %215 }
 0x1a4   :  { %v157_v33 = vrot.slane %v216_v32, %v156_v31 }
 0x1a6   :  { %160 = vst.msk [vmem:[#allocation3] sm:$0x1] %vm159_vm4, %v157_v33 }
 0x1a7   :  { %228 = shalt.err (!%p225_p4)
}
 0x1a8   :  { %s229_s10 = scalar_lea.hbm %s320_s5, 16 }
 0x1a9   :  { %p230_p5 = scmp.ne.s32.totalorder %s320_s5, %s229_s10  ;;  %p233_p6 = scmp.lt.u32.totalorder %s229_s10, %s320_s5 }
 0x1ab   :  { %p235_p7 = pnand %p233_p6, %p230_p5 }
 0x1ad   :  { %238 = shalt.err (!%p235_p7)
}
 0x1ae   :  { %170 = dma.vmem_to_hbm [thread:$0]  %s168_s1, 16, %s320_s5, [#allocation4]  }
 0x1af   :  { %239 = dma.done.wait [#allocation4], 16  }
 0x1b0   :  { %240 = vsyncadd [#allocation4], 4294967280 }
 0x1b1   :  { %174 = vsyncpa [#allocation4], 1 }

</bundles_post_ra>
